<compile_context>
chip_gen: v5e
topology: v5e:2x2
jax: 0.10.0
libtpu: 0.0.40
codegen_flags: <defaults>
</compile_context>

<pallas_src>
import jax
import jax.numpy as jnp
import numpy as np
from jax.experimental import pallas as pl
from jax.experimental.pallas import tpu as pltpu


def _denseclip_kernel(x_ref, w_ref, cls_ref, txt_ref, out_ref):
    # x_ref:   (TB, P_pad)  patch-mean features for TB batch rows
    # w_ref:   (P_pad, D)   synthetic patch-embedding weight
    # cls_ref: (1, D)       synthetic class-token embedding (f32)
    # txt_ref: (D, C_pad)   text features: L2-normalized, *logit_scale, transposed
    # out_ref: (TB, C_pad)  logits tile
    #
    # 1. Patch embedding for TB rows in one MXU matmul (f32 accumulation).
    img = cls_ref[...] + jnp.dot(x_ref[...], w_ref[...],
                                 preferred_element_type=jnp.float32)   # (TB, D)

    # 2. L2 normalization via rsqrt (EUP slot); eps guards zero rows
    #    (including the zero-padded batch rows).
    sumsq = jnp.sum(img * img, axis=-1, keepdims=True)
    img_n = img * jax.lax.rsqrt(jnp.maximum(sumsq, 1e-30))             # (TB, D)

    # 3. Logits: plain (TB, D) @ (D, C_pad) — text block pre-transposed once
    #    in the wrapper, logit_scale already folded in.
    out_ref[...] = jnp.dot(img_n.astype(txt_ref.dtype), txt_ref[...],
                           preferred_element_type=jnp.float32)         # (TB, C_pad)


def _round_up(x, m):
    return ((x + m - 1) // m) * m


def denseclip_forward(image_nchw, w_patch, cls_emb, text_feats, logit_scale,
                      patch=4, matmul_dtype=jnp.float32, tb=8):
    """NCHW image -> DenseCLIP logits (B, num_classes) via one fused kernel."""
    B, C, H, W = image_nchw.shape
    assert H % patch == 0 and W % patch == 0
    nH, nW = H // patch, W // patch
    P = C * patch * patch
    D = w_patch.shape[1]
    num_classes = text_feats.shape[0]

    # --- wrapper prep (all tiny, batch-invariant or (B, P)-sized) ----------
    # Patch mean straight from NCHW: mean over the nH/nW grid, feature order
    # (C, ph, pw) matches the im2col token layout.  No (B, N, P) intermediate.
    x_mean = image_nchw.reshape(B, C, nH, patch, nW, patch).mean(axis=(2, 4))
    x_mean = x_mean.reshape(B, P)

    TB = tb
    B_pad = _round_up(B, TB)
    P_pad = _round_up(max(P, 128), 128)          # lane-dense MXU contraction
    C_pad = _round_up(max(num_classes, 128), 128)  # lane-dense logits stores

    x_p = jnp.pad(x_mean, ((0, B_pad - B), (0, P_pad - P))).astype(matmul_dtype)
    w_p = jnp.pad(w_patch, ((0, P_pad - P), (0, 0))).astype(matmul_dtype)

    # Text prep (runs once, plain JAX): L2-normalize, fold logit_scale, pad
    # class dim, pre-transpose to (D, C_pad).
    txt_sumsq = jnp.sum(text_feats * text_feats, axis=-1, keepdims=True)
    txt_n = text_feats * jax.lax.rsqrt(jnp.maximum(txt_sumsq, 1e-30))
    txt_t = (logit_scale[0] * txt_n).T                                  # (D, C)
    txt_t = jnp.pad(txt_t, ((0, 0), (0, C_pad - num_classes)))
    txt_t = txt_t.astype(matmul_dtype)

    cls_f32 = cls_emb.astype(jnp.float32)

    # --- fused per-batch-tile kernel ----------------------------------------
    out = pl.pallas_call(
        _denseclip_kernel,
        out_shape=jax.ShapeDtypeStruct((B_pad, C_pad), jnp.float32),
        grid=(B_pad // TB,),
        in_specs=[
            pl.BlockSpec((TB, P_pad), lambda b: (b, 0)),   # patch-mean tile
            pl.BlockSpec((P_pad, D), lambda b: (0, 0)),    # patch-embed W
            pl.BlockSpec((1, D), lambda b: (0, 0)),        # class embedding
            pl.BlockSpec((D, C_pad), lambda b: (0, 0)),    # scaled text^T
        ],
        out_specs=pl.BlockSpec((TB, C_pad), lambda b: (b, 0)),
        compiler_params=pltpu.CompilerParams(
            dimension_semantics=("parallel",),             # megacore over batch tiles
            vmem_limit_bytes=32 * 1024 * 1024),
    )(x_p, w_p, cls_f32, txt_t)

    return out[:B, :num_classes]


def denseclip_reference(image_nchw, w_patch, cls_emb, text_feats, logit_scale,
                        patch=4):
    B, C, H, W = image_nchw.shape
    nH, nW = H // patch, W // patch
    patches = image_nchw.reshape(B, C, nH, patch, nW, patch)
    patches = patches.transpose(0, 2, 4, 1, 3, 5).reshape(B, nH * nW, -1)
    tokens = jnp.einsum("bnp,pd->bnd", patches, w_patch,
                        precision=jax.lax.Precision.HIGHEST)
    img = cls_emb + jnp.mean(tokens, axis=1)
    img_n = img / jnp.linalg.norm(img, axis=-1, keepdims=True)
    txt_n = text_feats / jnp.linalg.norm(text_feats, axis=-1, keepdims=True)
    return logit_scale[0] * jnp.einsum("bd,cd->bc", img_n, txt_n,
                                       precision=jax.lax.Precision.HIGHEST)


if __name__ == "__main__":
    # Small synthetic shapes consistent with the module's forward.
    B, C_in, H, W = 2, 4, 16, 16          # image: NCHW
    patch = 4
    P = C_in * patch * patch              # 64 patch feature dim
    D = 128                               # embedding dim
    num_classes = 8                       # len(classnames)

    key = jax.random.PRNGKey(0)
    k_img, k_w, k_cls, k_txt = jax.random.split(key, 4)

    image = jax.random.normal(k_img, (B, C_in, H, W), dtype=jnp.float32)
    w_patch = jax.random.normal(k_w, (P, D), dtype=jnp.float32) * 0.02
    cls_emb = jax.random.normal(k_cls, (1, D), dtype=jnp.float32) * 0.02
    # stand-in for text_encoder(prompt_learner(), tokenized_prompts)
    text_feats = jax.random.normal(k_txt, (num_classes, D), dtype=jnp.float32)
    # CLIP: logit_scale = nn.Parameter(log(1/0.07)); forward uses .exp()
    logit_scale = jnp.array([1.0 / 0.07], dtype=jnp.float32)

    logits = denseclip_forward(image, w_patch, cls_emb, text_feats,
                               logit_scale, patch=patch)
    logits = jax.block_until_ready(logits)

    ref = denseclip_reference(image, w_patch, cls_emb, text_feats,
                              logit_scale, patch=patch)

    assert logits.shape == (B, num_classes), logits.shape
    np.testing.assert_allclose(np.asarray(logits), np.asarray(ref),
                               rtol=1e-4, atol=1e-4)
    print("KERNEL_OK")
</pallas_src>

<mosaic_0001>
module attributes {stable_mosaic.version = 11 : i64} {
  func.func @_denseclip_kernel(%arg0: i32, %arg1: memref<8x128xf32, #tpu.memory_space<vmem>>, %arg2: memref<128x128xf32, #tpu.memory_space<vmem>>, %arg3: memref<1x128xf32, #tpu.memory_space<vmem>>, %arg4: memref<128x128xf32, #tpu.memory_space<vmem>>, %arg5: memref<8x128xf32, #tpu.memory_space<vmem>>) attributes {dimension_semantics = [#tpu.dimension_semantics<parallel>], iteration_bounds = array<i64: 1>, scalar_prefetch = 0 : i64, scratch_operands = 0 : i64, tpu.core_type = #tpu.core_type<tc>, window_params = [{transform_indices = @transform_0, window_bounds = array<i64: 8, 128>}, {pipeline_mode = #tpu.pipeline_mode<synchronous>, transform_indices = @transform_1, window_bounds = array<i64: 128, 128>}, {pipeline_mode = #tpu.pipeline_mode<synchronous>, transform_indices = @transform_2, window_bounds = array<i64: 1, 128>}, {pipeline_mode = #tpu.pipeline_mode<synchronous>, transform_indices = @transform_3, window_bounds = array<i64: 128, 128>}, {transform_indices = @transform_4, window_bounds = array<i64: 8, 128>}]} {
    %c0 = arith.constant 0 : index
    %c0_0 = arith.constant 0 : index
    %0 = vector.load %arg3[%c0, %c0_0] : memref<1x128xf32, #tpu.memory_space<vmem>>, vector<1x128xf32>
    %c0_1 = arith.constant 0 : index
    %c0_2 = arith.constant 0 : index
    %1 = vector.load %arg1[%c0_1, %c0_2] : memref<8x128xf32, #tpu.memory_space<vmem>>, vector<8x128xf32>
    %c0_3 = arith.constant 0 : index
    %c0_4 = arith.constant 0 : index
    %2 = vector.load %arg2[%c0_3, %c0_4] : memref<128x128xf32, #tpu.memory_space<vmem>>, vector<128x128xf32>
    %cst = arith.constant dense<0.000000e+00> : vector<8x128xf32>
    %3 = tpu.matmul %1, %2, %cst {dimension_numbers = #tpu.dot_dimension_numbers<[1], [0], [0], [1], [0, 0, 1, 1], [], []>} : vector<8x128xf32>, vector<128x128xf32>, vector<8x128xf32> -> vector<8x128xf32>
    %4 = vector.broadcast %0 : vector<1x128xf32> to vector<8x128xf32>
    %5 = arith.addf %4, %3 : vector<8x128xf32>
    %6 = arith.mulf %5, %5 : vector<8x128xf32>
    %cst_5 = arith.constant dense<0.000000e+00> : vector<8xf32>
    %7 = vector.multi_reduction <add>, %6, %cst_5 [1] : vector<8x128xf32> to vector<8xf32>
    %8 = vector.shape_cast %7 : vector<8xf32> to vector<8x1xf32>
    %cst_6 = arith.constant 1.000000e-30 : f32
    %9 = vector.broadcast %cst_6 : f32 to vector<8x1xf32>
    %10 = arith.maximumf %8, %9 : vector<8x1xf32>
    %11 = math.rsqrt %10 : vector<8x1xf32>
    %12 = vector.broadcast %11 : vector<8x1xf32> to vector<8x128xf32>
    %13 = arith.mulf %5, %12 : vector<8x128xf32>
    %c0_7 = arith.constant 0 : index
    %c0_8 = arith.constant 0 : index
    %14 = vector.load %arg4[%c0_7, %c0_8] : memref<128x128xf32, #tpu.memory_space<vmem>>, vector<128x128xf32>
    %cst_9 = arith.constant dense<0.000000e+00> : vector<8x128xf32>
    %15 = tpu.matmul %13, %14, %cst_9 {dimension_numbers = #tpu.dot_dimension_numbers<[1], [0], [0], [1], [0, 0, 1, 1], [], []>} : vector<8x128xf32>, vector<128x128xf32>, vector<8x128xf32> -> vector<8x128xf32>
    %c0_10 = arith.constant 0 : index
    %c0_11 = arith.constant 0 : index
    %16 = vector.load %arg5[%c0_10, %c0_11] : memref<8x128xf32, #tpu.memory_space<vmem>>, vector<8x128xf32>
    tpu.vector_store %arg5[%c0_10, %c0_11], %15 {strides = array<i32>} : memref<8x128xf32, #tpu.memory_space<vmem>>, vector<8x128xf32>,
    return
  }
  func.func @transform_0(%arg0: i32) -> (i32, i32) {
    %c0_i32 = arith.constant 0 : i32
    %c0_i32_0 = arith.constant 0 : i32
    return %arg0, %c0_i32 : i32, i32
  }
  func.func @transform_1(%arg0: i32) -> (i32, i32) {
    %c0_i32 = arith.constant 0 : i32
    %c0_i32_0 = arith.constant 0 : i32
    %c0_i32_1 = arith.constant 0 : i32
    return %c0_i32, %c0_i32_0 : i32, i32
  }
  func.func @transform_2(%arg0: i32) -> (i32, i32) {
    %c0_i32 = arith.constant 0 : i32
    %c0_i32_0 = arith.constant 0 : i32
    %c0_i32_1 = arith.constant 0 : i32
    return %c0_i32, %c0_i32_0 : i32, i32
  }
  func.func @transform_3(%arg0: i32) -> (i32, i32) {
    %c0_i32 = arith.constant 0 : i32
    %c0_i32_0 = arith.constant 0 : i32
    %c0_i32_1 = arith.constant 0 : i32
    return %c0_i32, %c0_i32_0 : i32, i32
  }
  func.func @transform_4(%arg0: i32) -> (i32, i32) {
    %c0_i32 = arith.constant 0 : i32
    %c0_i32_0 = arith.constant 0 : i32
    return %arg0, %c0_i32 : i32, i32
  }
}

</mosaic_0001>

<bundles_post_ra>
// kernel: tpu_custom_call.1
= control target key start
LH: loop header
LB: loop body
LE: loop exit
PB: predicated region body
PF: predicated region fallthrough
CT: control target
= control target key end

     0   :  { %9 = vsyncpa [#allocation3], 0  ;;  %s332_s0 = inlined_call_operand.hbm [shape: f32[8,128], index: 0, kind: input, shape index: {}]   ;;  %s333_s1 = inlined_call_operand.hbm [shape: f32[128,128], index: 1, kind: input, shape index: {}]   ;;  %s334_s2 = inlined_call_operand.vmem [shape: f32[1,128], index: 2, kind: input, shape index: {}]   ;;  %s335_s3 = inlined_call_operand.hbm [shape: f32[128,128], index: 3, kind: input, shape index: {}]   ;;  %s336_s4 = inlined_call_operand.hbm [shape: f32[8,128], index: 4, kind: output, shape index: {}]  }
   0x1   :  { %10 = vsyncpa [#allocation6], 0  ;;  %s27_s17 = sshll.u32 %s333_s1, 4  ;;  %s28_s17 = int_to_ptr.hbm [resolvable:$true] %s27_s17 }
   0x2   :  { %11 = vsyncpa [#allocation4], 0  ;;  %s286_s18 = smov [#allocation5]   ;;  %s17_s22 = sshll.u32 %s332_s0, 4  ;;  %s18_s22 = int_to_ptr.hbm [resolvable:$true] %s17_s22 }
   0x3   :  { %s29_s19 = sshll.u32 %s286_s18, 4  ;;  %s287_s23 = smov 128   ;;  %s30_s19 = int_to_ptr.vmem [resolvable:$true] %s29_s19 }
   0x4   :  { %s288_s24 = smov 8   ;;  %s289_s25 = smov [#allocation2]  }
   0x5   :  { %35 = dma.hbm_to_vmem [thread:$0]  %s28_s17, 2048, %s30_s19, [#allocation6], %s287_s23, %s287_s23, %s288_s24  }
   0x6   :  { %s19_s26 = sshll.u32 %s289_s25, 4  ;;  %s42_s29 = sshll.u32 %s335_s3, 4  ;;  %s20_s26 = int_to_ptr.vmem [resolvable:$true] %s19_s26  ;;  %s43_s29 = int_to_ptr.hbm [resolvable:$true] %s42_s29 }
   0x7   :  { %22 = dma.hbm_to_vmem [thread:$0]  %s18_s22, 128, %s20_s26, [#allocation3]  }
   0x8   :  { %s290_s1 = smov [#allocation7]  }
   0x9   :  { %s44_s30 = sshll.u32 %s290_s1, 4  ;;  %s45_s30 = int_to_ptr.vmem [resolvable:$true] %s44_s30 }
   0xa   :  { %50 = dma.hbm_to_vmem [thread:$0]  %s43_s29, 2048, %s45_s30, [#allocation6], %s287_s23, %s287_s23, %s288_s24  }
   0xb   :  { %280 = dma.done.wait [#allocation3], 128  }
   0xc   :  { %281 = vsyncadd [#allocation3], 4294967168 }
   0xd   :  { %282 = dma.done.wait [#allocation6], 4096  }
   0xe   :  { %283 = vsyncadd [#allocation6], 4294963200  ;;  %v80_v0 = vld [vmem:[#allocation5 + $0x78] sm:$0xff]  ;;  %v79_v1 = vld [vmem:[#allocation5 + $0x70] sm:$0xff]  ;;  %s164_s8 = sshll.u32 %s336_s4, 4  ;;  %s165_s8 = int_to_ptr.hbm [resolvable:$true] %s164_s8 }
   0xf   :  { %81 = vmatpush.msra.mxu0 %v80_v0  ;;  %v78_v2 = vld [vmem:[#allocation5 + $0x68] sm:$0xff]  ;;  %v77_v3 = vld [vmem:[#allocation5 + $0x60] sm:$0xff]  ;;  %v76_v4 = vld [vmem:[#allocation5 + $0x58] sm:$0xff] }
  0x10   :  { %v75_v5 = vld [vmem:[#allocation5 + $0x50] sm:$0xff]  ;;  %v74_v6 = vld [vmem:[#allocation5 + $0x48] sm:$0xff]  ;;  %v73_v7 = vld [vmem:[#allocation5 + $0x40] sm:$0xff] }
  0x11   :  { %82 = vmatpush.msra.mxu0 %v79_v1  ;;  %v72_v8 = vld [vmem:[#allocation5 + $0x38] sm:$0xff]  ;;  %v71_v9 = vld [vmem:[#allocation5 + $0x30] sm:$0xff]  ;;  %v70_v10 = vld [vmem:[#allocation5 + $0x28] sm:$0xff] }
  0x12   :  { %v69_v11 = vld [vmem:[#allocation5 + $0x20] sm:$0xff]  ;;  %v68_v12 = vld [vmem:[#allocation5 + $0x18] sm:$0xff]  ;;  %v67_v13 = vld [vmem:[#allocation5 + $0x10] sm:$0xff] }
  0x13   :  { %83 = vmatpush.msra.mxu0 %v78_v2  ;;  %v66_v14 = vld [vmem:[#allocation5 + $0x8] sm:$0xff]  ;;  %v65_v15 = vld [vmem:[#allocation5] sm:$0xff]  ;;  %v64_v16 = vld [vmem:[#allocation2] sm:$0xff] }
  0x14   :  { %v135_v17 = vld [vmem:[#allocation7 + $0x78] sm:$0xff]  ;;  %v134_v18 = vld [vmem:[#allocation7 + $0x70] sm:$0xff]  ;;  %v133_v19 = vld [vmem:[#allocation7 + $0x68] sm:$0xff] }
  0x15   :  { %84 = vmatpush.msra.mxu0 %v77_v3  ;;  %136 = vmatpush.msra.mxu1 %v135_v17  ;;  %v132_v20 = vld [vmem:[#allocation7 + $0x60] sm:$0xff]  ;;  %v181_v21 = vld [vmem:[%s334_s2] ss:$0 sm:$0xff]  ;;  %v130_v26 = vld [vmem:[#allocation7 + $0x50] sm:$0xff]  ;;  %s291_s2 = smov [#allocation8]  }
  0x16   :  { %v131_v25 = vld [vmem:[#allocation7 + $0x58] sm:$0xff]  ;;  %v129_v27 = vld [vmem:[#allocation7 + $0x48] sm:$0xff]  ;;  %v128_v28 = vld [vmem:[#allocation7 + $0x40] sm:$0xff]  ;;  %s162_s5 = sshll.u32 %s291_s2, 4  ;;  %s163_s5 = int_to_ptr.vmem [resolvable:$true] %s162_s5 }
  0x17   :  { %85 = vmatpush.msra.mxu0 %v76_v4  ;;  %137 = vmatpush.msra.mxu1 %v134_v18  ;;  %v127_v29 = vld [vmem:[#allocation7 + $0x38] sm:$0xff]  ;;  %v126_v30 = vld [vmem:[#allocation7 + $0x30] sm:$0xff]  ;;  %v125_v31 = vld [vmem:[#allocation7 + $0x28] sm:$0xff] }
  0x18   :  { %v124_v32 = vld [vmem:[#allocation7 + $0x20] sm:$0xff]  ;;  %v123_v33 = vld [vmem:[#allocation7 + $0x18] sm:$0xff]  ;;  %v122_v34 = vld [vmem:[#allocation7 + $0x10] sm:$0xff] }
  0x19   :  { %86 = vmatpush.msra.mxu0 %v75_v5  ;;  %138 = vmatpush.msra.mxu1 %v133_v19  ;;  %v121_v35 = vld [vmem:[#allocation7 + $0x8] sm:$0xff]  ;;  %v120_v36 = vld [vmem:[#allocation7] sm:$0xff] }
  0x1b   :  { %87 = vmatpush.msra.mxu0 %v74_v6  ;;  %139 = vmatpush.msra.mxu1 %v132_v20 }
  0x1d   :  { %88 = vmatpush.msra.mxu0 %v73_v7  ;;  %140 = vmatpush.msra.mxu1 %v131_v25 }
  0x1f   :  { %89 = vmatpush.msra.mxu0 %v72_v8  ;;  %141 = vmatpush.msra.mxu1 %v130_v26 }
  0x21   :  { %90 = vmatpush.msra.mxu0 %v71_v9  ;;  %142 = vmatpush.msra.mxu1 %v129_v27 }
  0x23   :  { %91 = vmatpush.msra.mxu0 %v70_v10  ;;  %143 = vmatpush.msra.mxu1 %v128_v28 }
  0x25   :  { %92 = vmatpush.msra.mxu0 %v69_v11  ;;  %144 = vmatpush.msra.mxu1 %v127_v29 }
  0x27   :  { %93 = vmatpush.msra.mxu0 %v68_v12  ;;  %145 = vmatpush.msra.mxu1 %v126_v30 }
  0x29   :  { %94 = vmatpush.msra.mxu0 %v67_v13  ;;  %146 = vmatpush.msra.mxu1 %v125_v31 }
  0x2b   :  { %95 = vmatpush.msra.mxu0 %v66_v14  ;;  %147 = vmatpush.msra.mxu1 %v124_v32 }
  0x2d   :  { %96 = vmatpush.msra.mxu0 %v65_v15  ;;  %148 = vmatpush.msra.mxu1 %v123_v33 }
  0x2e   :  { %97 = vmatmul.f32.vlgmr.msra.gmra.mxu0 %v64_v16 }
  0x2f   :  { %149 = vmatpush.msra.mxu1 %v122_v34 }
  0x31   :  { %150 = vmatpush.msra.mxu1 %v121_v35 }
  0x33   :  { %151 = vmatpush.msra.mxu1 %v120_v36 }
  0xab   :  { %v98_v22 = vpop.f32.mrf.mxu0 }
  0xac   :  { %v104_v23 = vadd.f32 %v181_v21, %v98_v22 }
  0xae   :  { %v105_v24 = vmul.f32 %v104_v23, %v104_v23 }
  0xb0   :  { %106 = vadd.xlane.f32.xlu0 %v105_v24 }
 0x123   :  { %v107_v37 = vpop.xlane.xlu0 %106 }
 0x124   :  { %v108_v38 = vmax.f32 %v107_v37, 1e-30 }
 0x126   :  { %182 = vrsqrt.f32 %v108_v38  ;;  %vm115_vm1 = vweird.f32 %v108_v38 }
 0x12c   :  { %v183_v39 = vpop.eup %182 }
 0x12d   :  { %v110_v40 = vmul.f32 %v183_v39, %v108_v38  ;;  %vm116_vm0 = vweird.f32 %v183_v39 }
 0x12e   :  { %vm117_vm2 = vmor %vm115_vm1, %vm116_vm0 }
 0x12f   :  { %v111_v41 = vmul.f32 %v183_v39, %v110_v40 }
 0x131   :  { %v112_v42 = vmul.f32 0.5, %v111_v41 }
 0x133   :  { %v113_v43 = vsub.f32 1.5, %v112_v42 }
 0x135   :  { %v114_v44 = vmul.f32 %v183_v39, %v113_v43 }
 0x137   :  { %v118_v45 = vsel %vm117_vm2, %v183_v39, %v114_v44 }
 0x138   :  { %v119_v46 = vmul.f32 %v118_v45, %v104_v23 }
 0x13a   :  { %152 = vmatmul.f32.vlgmr.msra.gmra.mxu1 %v119_v46 }
 0x1b7   :  { %v153_v47 = vpop.f32.mrf.mxu1 }
 0x1b8   :  { %156 = vst [vmem:[#allocation8] sm:$0xff] %v153_v47 }
 0x1b9   :  { %167 = dma.vmem_to_hbm [thread:$0]  %s163_s5, 128, %s165_s8, [#allocation4]  }
 0x1ba   :  { %284 = dma.done.wait [#allocation4], 128  }
 0x1bb   :  { %285 = vsyncadd [#allocation4], 4294967168 }
 0x1bc   :  { %172 = vsyncpa [#allocation3], 1 }
 0x1bd   :  { %173 = vsyncpa [#allocation6], 1 }
 0x1be   :  { %174 = vsyncpa [#allocation4], 1 }

</bundles_post_ra>
